<compile_context>
chip_gen: v7x
topology: tpu7x:2x2x1
jax: 0.10.0
libtpu: 0.0.40
codegen_flags: <defaults>
</compile_context>

<pallas_src>
import jax
import jax.numpy as jnp
from jax.experimental import pallas as pl
from jax.experimental.pallas import tpu as pltpu

VMEM_SPEC = pl.BlockSpec(memory_space=pltpu.MemorySpace.VMEM)
PAD = 2           # 'same' padding for the largest kernel (k=5)
NEG_SLOPE = 0.01  # nn.LeakyReLU default


# ----------------------------- fused kernel ----------------------------------

def _fused_kernel(ids_ref, ttype_ref, mask_ref, labels_ref,
                  emb_word_ref, emb_type_ref, emb_pos_ref,
                  w_plm_ref, b_plm_ref,
                  w_conv_ref, b_conv_ref, w_proj_ref, b_proj_ref,
                  w1_ref, b1_ref, w2_ref, b2_ref,
                  out_ref):
    f32 = jnp.float32
    BS = ids_ref.shape[0]
    S, H = emb_pos_ref.shape
    B = BS // S
    V = emb_word_ref.shape[0]
    T = emb_type_ref.shape[0]
    C = w2_ref.shape[-1]
    F3 = w_conv_ref.shape[-1]
    K = 2 * PAD + 1                     # number of im2col shift blocks

    # ---- embedding lookup as one-hot MXU matmuls (no XLA gather) ----
    ids = ids_ref[...]                                            # (BS,1) i32
    one_w = (jax.lax.broadcasted_iota(jnp.int32, (BS, V), 1) == ids).astype(f32)
    emb = jnp.dot(one_w, emb_word_ref[...], preferred_element_type=f32)
    tt = ttype_ref[...]                                           # (BS,1) i32
    one_t = (jax.lax.broadcasted_iota(jnp.int32, (BS, T), 1) == tt).astype(f32)
    emb = emb + jnp.dot(one_t, emb_type_ref[...], preferred_element_type=f32)
    pos = emb_pos_ref[...]                                        # (S,H)
    emb = emb + jnp.concatenate([pos] * B, axis=0)                # (BS,H)

    # ---- synthetic PLM: dense + tanh, masked by attention_mask ----
    hidden = jnp.tanh(
        jnp.dot(emb, w_plm_ref[...], preferred_element_type=f32) + b_plm_ref[...])
    hidden = hidden * mask_ref[...]                               # (BS,H)

    # ---- MultiKernelCNN (k=1/3/5, 'same' pad) as ONE im2col matmul ----
    h3 = hidden.reshape(B, S, H)
    zpad = jnp.zeros((B, PAD, H), f32)
    xpad = jnp.concatenate([zpad, h3, zpad], axis=1)              # (B,S+4,H)
    slab = jnp.concatenate([xpad[:, t:t + S, :] for t in range(K)], axis=-1)
    slab = slab.reshape(BS, K * H)                                # (BS,5H)
    acc = (jnp.dot(slab, w_conv_ref[...], preferred_element_type=f32)
           + b_conv_ref[...])
    acc = jnp.maximum(acc, 0.0)                                   # ReLU
    pooled = jnp.max(acc.reshape(B, S, F3), axis=1)               # max over seq
    cnn = (jnp.dot(pooled, w_proj_ref[...], preferred_element_type=f32)
           + b_proj_ref[...])                                     # (B,H)

    # ---- FFN head (dropout = identity in eval) ----
    z = jnp.dot(cnn, w1_ref[...], preferred_element_type=f32) + b1_ref[...]
    z = jnp.where(z > 0, z, NEG_SLOPE * z)                        # LeakyReLU
    logits = jnp.dot(z, w2_ref[...], preferred_element_type=f32) + b2_ref[...]

    # ---- softmax max / argmax / cross-entropy ----
    m = jnp.max(logits, axis=-1, keepdims=True)                   # (B,1)
    e = jnp.exp(logits - m)
    denom = jnp.sum(e, axis=-1, keepdims=True)
    probs = pl.reciprocal(denom, approx=True)      # max softmax prob = 1/denom
    iota_c = jax.lax.broadcasted_iota(jnp.int32, logits.shape, 1)
    preds = jnp.min(jnp.where(logits >= m, iota_c, C), axis=-1, keepdims=True)

    labels = labels_ref[...]                                      # (B,1) i32
    one_l = (jax.lax.broadcasted_iota(jnp.int32, (B, C), 1) == labels).astype(f32)
    lse = m + jnp.log(denom)
    picked = jnp.sum(one_l * logits, axis=-1, keepdims=True)
    loss = jnp.mean(lse - picked, axis=0, keepdims=True)          # (1,1)

    # ---- pack everything into one lane-dense output slab ----
    out_ref[...] = jnp.zeros_like(out_ref)
    out_ref[0:B, 0:C] = logits
    out_ref[0:B, C:C + 1] = probs
    out_ref[0:B, C + 1:C + 2] = preds.astype(f32)
    out_ref[0:1, C + 2:C + 3] = loss


# ----------------------------- wrapper ----------------------------------------

def init_params(key, vocab=50, type_vocab=2, max_pos=8, H=32, F=16, C=3):
    M = H // 2
    ks = jax.random.split(key, 14)

    def nrm(k, shape, scale=0.05):
        return (scale * jax.random.normal(k, shape)).astype(jnp.float32)

    return {
        'emb_word': nrm(ks[0], (vocab, H)),
        'emb_type': nrm(ks[1], (type_vocab, H)),
        'emb_pos':  nrm(ks[2], (max_pos, H)),
        'w_plm':    nrm(ks[3], (H, H)),
        'b_plm':    nrm(ks[4], (1, H)),
        'w_conv1':  nrm(ks[5], (1, H, F)),
        'b_conv1':  nrm(ks[6], (1, F)),
        'w_conv3':  nrm(ks[7], (3, H, F)),
        'b_conv3':  nrm(ks[8], (1, F)),
        'w_conv5':  nrm(ks[9], (5, H, F)),
        'b_conv5':  nrm(ks[10], (1, F)),
        'w_proj':   nrm(ks[11], (3 * F, H)),
        'b_proj':   nrm(ks[12], (1, H)),
        'w1':       nrm(ks[13], (H, M)),
        'b1':       jnp.zeros((1, M), jnp.float32),
        'w2':       nrm(jax.random.fold_in(key, 99), (M, C)),
        'b2':       jnp.zeros((1, C), jnp.float32),
    }


def _pack_conv_weights(params):
    """Pack (k,H,F) conv taps for k in (1,3,5) into one (5H,3F) im2col weight.

    im2col slab block t (rows t*H:(t+1)*H) holds x[s + t - 2] (zero-padded),
    matching Conv1d 'same' padding: kernel k uses taps t = 2-k//2 .. 2+k//2.
    """
    H = params['w_plm'].shape[0]
    F = params['w_conv1'].shape[-1]
    w = jnp.zeros((5 * H, 3 * F), jnp.float32)
    w = w.at[2 * H:3 * H, 0:F].set(params['w_conv1'][0])            # k=1
    for j in range(3):                                               # k=3
        w = w.at[(1 + j) * H:(2 + j) * H, F:2 * F].set(params['w_conv3'][j])
    for j in range(5):                                               # k=5
        w = w.at[j * H:(j + 1) * H, 2 * F:3 * F].set(params['w_conv5'][j])
    b = jnp.concatenate([params['b_conv1'], params['b_conv3'],
                         params['b_conv5']], axis=-1)                # (1,3F)
    return w, b


@jax.jit
def model_forward(params, input_ids, attention_mask, token_type_ids,
                  labels=None):
    B, S = input_ids.shape
    C = params['w2'].shape[-1]
    BS = B * S

    w_conv, b_conv = _pack_conv_weights(params)

    ids = input_ids.reshape(BS, 1).astype(jnp.int32)
    tt = token_type_ids.reshape(BS, 1).astype(jnp.int32)
    mask = attention_mask.reshape(BS, 1).astype(jnp.float32)
    labels_arr = (labels if labels is not None
                  else jnp.zeros((B,), jnp.int32)).reshape(B, 1).astype(jnp.int32)

    R = max(8, ((B + 7) // 8) * 8)     # sublane-padded rows of the output slab
    slab = pl.pallas_call(
        _fused_kernel,
        out_shape=jax.ShapeDtypeStruct((R, 128), jnp.float32),
        in_specs=[VMEM_SPEC] * 17,
        out_specs=VMEM_SPEC,
    )(ids, tt, mask, labels_arr,
      params['emb_word'], params['emb_type'], params['emb_pos'],
      params['w_plm'], params['b_plm'],
      w_conv, b_conv, params['w_proj'], params['b_proj'],
      params['w1'], params['b1'], params['w2'], params['b2'])

    results = {
        'logits': slab[:B, :C],
        'probs':  slab[:B, C],
        'preds':  slab[:B, C + 1].astype(jnp.int32),
    }
    if labels is not None:
        results['loss'] = slab[0, C + 2]
    return results


# ----------------------------- demo -------------------------------------------

if __name__ == "__main__":
    key = jax.random.PRNGKey(0)
    B, S, H, F, C, V = 2, 8, 32, 16, 3, 50

    pkey, dkey = jax.random.split(key)
    params = init_params(pkey, vocab=V, type_vocab=2, max_pos=S, H=H, F=F, C=C)

    k1, k2 = jax.random.split(dkey)
    input_ids = jax.random.randint(k1, (B, S), 0, V, dtype=jnp.int32)
    attention_mask = jnp.ones((B, S), jnp.int32).at[:, S - 2:].set(0)
    token_type_ids = jnp.zeros((B, S), jnp.int32)
    labels = jax.random.randint(k2, (B,), 0, C, dtype=jnp.int32)

    out = model_forward(params, input_ids, attention_mask, token_type_ids,
                        labels)
    jax.block_until_ready(out)
    assert out['logits'].shape == (B, C)
    assert out['probs'].shape == (B,)
    assert out['preds'].shape == (B,)
    assert out['loss'].shape == ()
    print("KERNEL_OK")
</pallas_src>

<mosaic_0001>
module attributes {stable_mosaic.version = 11 : i64} {
  func.func @_fused_kernel(%arg0: memref<16x1xi32, #tpu.memory_space<vmem>>, %arg1: memref<16x1xi32, #tpu.memory_space<vmem>>, %arg2: memref<16x1xf32, #tpu.memory_space<vmem>>, %arg3: memref<2x1xi32, #tpu.memory_space<vmem>>, %arg4: memref<50x32xf32, #tpu.memory_space<vmem>>, %arg5: memref<2x32xf32, #tpu.memory_space<vmem>>, %arg6: memref<8x32xf32, #tpu.memory_space<vmem>>, %arg7: memref<32x32xf32, #tpu.memory_space<vmem>>, %arg8: memref<1x32xf32, #tpu.memory_space<vmem>>, %arg9: memref<160x48xf32, #tpu.memory_space<vmem>>, %arg10: memref<1x48xf32, #tpu.memory_space<vmem>>, %arg11: memref<48x32xf32, #tpu.memory_space<vmem>>, %arg12: memref<1x32xf32, #tpu.memory_space<vmem>>, %arg13: memref<32x16xf32, #tpu.memory_space<vmem>>, %arg14: memref<1x16xf32, #tpu.memory_space<vmem>>, %arg15: memref<16x3xf32, #tpu.memory_space<vmem>>, %arg16: memref<1x3xf32, #tpu.memory_space<vmem>>, %arg17: memref<8x128xf32, #tpu.memory_space<vmem>>) attributes {dimension_semantics = [], scalar_prefetch = 0 : i64, scratch_operands = 0 : i64, tpu.core_type = #tpu.core_type<tc>} {
    %c0 = arith.constant 0 : index
    %c0_0 = arith.constant 0 : index
    %0 = vector.load %arg0[%c0, %c0_0] : memref<16x1xi32, #tpu.memory_space<vmem>>, vector<16x1xi32>
    %1 = tpu.iota {dimensions = array<i32: 1>} : vector<16x50xi32>
    %2 = vector.broadcast %0 : vector<16x1xi32> to vector<16x50xi32>
    %3 = arith.cmpi eq, %1, %2 : vector<16x50xi32>
    %4 = arith.extui %3 : vector<16x50xi1> to vector<16x50xi32>
    %5 = arith.sitofp %4 : vector<16x50xi32> to vector<16x50xf32>
    %c0_1 = arith.constant 0 : index
    %c0_2 = arith.constant 0 : index
    %6 = vector.load %arg4[%c0_1, %c0_2] : memref<50x32xf32, #tpu.memory_space<vmem>>, vector<50x32xf32>
    %cst = arith.constant dense<0.000000e+00> : vector<16x32xf32>
    %7 = tpu.matmul %5, %6, %cst {dimension_numbers = #tpu.dot_dimension_numbers<[1], [0], [0], [1], [0, 0, 1, 1], [], []>} : vector<16x50xf32>, vector<50x32xf32>, vector<16x32xf32> -> vector<16x32xf32>
    %c0_3 = arith.constant 0 : index
    %c0_4 = arith.constant 0 : index
    %8 = vector.load %arg1[%c0_3, %c0_4] : memref<16x1xi32, #tpu.memory_space<vmem>>, vector<16x1xi32>
    %9 = tpu.iota {dimensions = array<i32: 1>} : vector<16x2xi32>
    %10 = vector.broadcast %8 : vector<16x1xi32> to vector<16x2xi32>
    %11 = arith.cmpi eq, %9, %10 : vector<16x2xi32>
    %12 = arith.extui %11 : vector<16x2xi1> to vector<16x2xi32>
    %13 = arith.sitofp %12 : vector<16x2xi32> to vector<16x2xf32>
    %c0_5 = arith.constant 0 : index
    %c0_6 = arith.constant 0 : index
    %14 = vector.load %arg5[%c0_5, %c0_6] : memref<2x32xf32, #tpu.memory_space<vmem>>, vector<2x32xf32>
    %cst_7 = arith.constant dense<0.000000e+00> : vector<16x32xf32>
    %15 = tpu.matmul %13, %14, %cst_7 {dimension_numbers = #tpu.dot_dimension_numbers<[1], [0], [0], [1], [0, 0, 1, 1], [], []>} : vector<16x2xf32>, vector<2x32xf32>, vector<16x32xf32> -> vector<16x32xf32>
    %16 = arith.addf %7, %15 : vector<16x32xf32>
    %c0_8 = arith.constant 0 : index
    %c0_9 = arith.constant 0 : index
    %17 = vector.load %arg6[%c0_8, %c0_9] : memref<8x32xf32, #tpu.memory_space<vmem>>, vector<8x32xf32>
    %18 = tpu.concatenate %17, %17 in 0 : vector<8x32xf32>, vector<8x32xf32> -> vector<16x32xf32>
    %19 = arith.addf %16, %18 : vector<16x32xf32>
    %c0_10 = arith.constant 0 : index
    %c0_11 = arith.constant 0 : index
    %20 = vector.load %arg7[%c0_10, %c0_11] : memref<32x32xf32, #tpu.memory_space<vmem>>, vector<32x32xf32>
    %cst_12 = arith.constant dense<0.000000e+00> : vector<16x32xf32>
    %21 = tpu.matmul %19, %20, %cst_12 {dimension_numbers = #tpu.dot_dimension_numbers<[1], [0], [0], [1], [0, 0, 1, 1], [], []>} : vector<16x32xf32>, vector<32x32xf32>, vector<16x32xf32> -> vector<16x32xf32>
    %c0_13 = arith.constant 0 : index
    %c0_14 = arith.constant 0 : index
    %22 = vector.load %arg8[%c0_13, %c0_14] : memref<1x32xf32, #tpu.memory_space<vmem>>, vector<1x32xf32>
    %23 = vector.broadcast %22 : vector<1x32xf32> to vector<16x32xf32>
    %24 = arith.addf %21, %23 : vector<16x32xf32>
    %25 = math.tanh %24 : vector<16x32xf32>
    %c0_15 = arith.constant 0 : index
    %c0_16 = arith.constant 0 : index
    %26 = vector.load %arg2[%c0_15, %c0_16] : memref<16x1xf32, #tpu.memory_space<vmem>>, vector<16x1xf32>
    %27 = vector.broadcast %26 : vector<16x1xf32> to vector<16x32xf32>
    %28 = arith.mulf %25, %27 : vector<16x32xf32>
    %29 = vector.shape_cast %28 : vector<16x32xf32> to vector<2x8x32xf32>
    %cst_17 = arith.constant 0.000000e+00 : f32
    %30 = vector.broadcast %cst_17 : f32 to vector<2x2x32xf32>
    %31 = tpu.concatenate %30, %29, %30 in 1 : vector<2x2x32xf32>, vector<2x8x32xf32>, vector<2x2x32xf32> -> vector<2x12x32xf32>
    %32 = vector.extract_strided_slice %31 {offsets = [0, 0, 0], sizes = [2, 8, 32], strides = [1, 1, 1]} : vector<2x12x32xf32> to vector<2x8x32xf32>
    %33 = vector.extract_strided_slice %31 {offsets = [0, 1, 0], sizes = [2, 8, 32], strides = [1, 1, 1]} : vector<2x12x32xf32> to vector<2x8x32xf32>
    %34 = vector.extract_strided_slice %31 {offsets = [0, 2, 0], sizes = [2, 8, 32], strides = [1, 1, 1]} : vector<2x12x32xf32> to vector<2x8x32xf32>
    %35 = vector.extract_strided_slice %31 {offsets = [0, 3, 0], sizes = [2, 8, 32], strides = [1, 1, 1]} : vector<2x12x32xf32> to vector<2x8x32xf32>
    %36 = vector.extract_strided_slice %31 {offsets = [0, 4, 0], sizes = [2, 8, 32], strides = [1, 1, 1]} : vector<2x12x32xf32> to vector<2x8x32xf32>
    %37 = tpu.concatenate %32, %33, %34, %35, %36 in 2 : vector<2x8x32xf32>, vector<2x8x32xf32>, vector<2x8x32xf32>, vector<2x8x32xf32>, vector<2x8x32xf32> -> vector<2x8x160xf32>
    %38 = vector.shape_cast %37 : vector<2x8x160xf32> to vector<16x160xf32>
    %c0_18 = arith.constant 0 : index
    %c0_19 = arith.constant 0 : index
    %39 = vector.load %arg9[%c0_18, %c0_19] : memref<160x48xf32, #tpu.memory_space<vmem>>, vector<160x48xf32>
    %cst_20 = arith.constant dense<0.000000e+00> : vector<16x48xf32>
    %40 = tpu.matmul %38, %39, %cst_20 {dimension_numbers = #tpu.dot_dimension_numbers<[1], [0], [0], [1], [0, 0, 1, 1], [], []>} : vector<16x160xf32>, vector<160x48xf32>, vector<16x48xf32> -> vector<16x48xf32>
    %c0_21 = arith.constant 0 : index
    %c0_22 = arith.constant 0 : index
    %41 = vector.load %arg10[%c0_21, %c0_22] : memref<1x48xf32, #tpu.memory_space<vmem>>, vector<1x48xf32>
    %42 = vector.broadcast %41 : vector<1x48xf32> to vector<16x48xf32>
    %43 = arith.addf %40, %42 : vector<16x48xf32>
    %cst_23 = arith.constant 0.000000e+00 : f32
    %44 = vector.broadcast %cst_23 : f32 to vector<16x48xf32>
    %45 = arith.maximumf %43, %44 : vector<16x48xf32>
    %46 = vector.shape_cast %45 : vector<16x48xf32> to vector<2x8x48xf32>
    %cst_24 = arith.constant dense<0xFF800000> : vector<2x48xf32>
    %47 = vector.multi_reduction <maximumf>, %46, %cst_24 [1] : vector<2x8x48xf32> to vector<2x48xf32>
    %c0_25 = arith.constant 0 : index
    %c0_26 = arith.constant 0 : index
    %48 = vector.load %arg11[%c0_25, %c0_26] : memref<48x32xf32, #tpu.memory_space<vmem>>, vector<48x32xf32>
    %cst_27 = arith.constant dense<0.000000e+00> : vector<2x32xf32>
    %49 = tpu.matmul %47, %48, %cst_27 {dimension_numbers = #tpu.dot_dimension_numbers<[1], [0], [0], [1], [0, 0, 1, 1], [], []>} : vector<2x48xf32>, vector<48x32xf32>, vector<2x32xf32> -> vector<2x32xf32>
    %c0_28 = arith.constant 0 : index
    %c0_29 = arith.constant 0 : index
    %50 = vector.load %arg12[%c0_28, %c0_29] : memref<1x32xf32, #tpu.memory_space<vmem>>, vector<1x32xf32>
    %51 = vector.broadcast %50 : vector<1x32xf32> to vector<2x32xf32>
    %52 = arith.addf %49, %51 : vector<2x32xf32>
    %c0_30 = arith.constant 0 : index
    %c0_31 = arith.constant 0 : index
    %53 = vector.load %arg13[%c0_30, %c0_31] : memref<32x16xf32, #tpu.memory_space<vmem>>, vector<32x16xf32>
    %cst_32 = arith.constant dense<0.000000e+00> : vector<2x16xf32>
    %54 = tpu.matmul %52, %53, %cst_32 {dimension_numbers = #tpu.dot_dimension_numbers<[1], [0], [0], [1], [0, 0, 1, 1], [], []>} : vector<2x32xf32>, vector<32x16xf32>, vector<2x16xf32> -> vector<2x16xf32>
    %c0_33 = arith.constant 0 : index
    %c0_34 = arith.constant 0 : index
    %55 = vector.load %arg14[%c0_33, %c0_34] : memref<1x16xf32, #tpu.memory_space<vmem>>, vector<1x16xf32>
    %56 = vector.broadcast %55 : vector<1x16xf32> to vector<2x16xf32>
    %57 = arith.addf %54, %56 : vector<2x16xf32>
    %cst_35 = arith.constant 0.000000e+00 : f32
    %58 = vector.broadcast %cst_35 : f32 to vector<2x16xf32>
    %59 = arith.cmpf ogt, %57, %58 : vector<2x16xf32>
    %cst_36 = arith.constant 0.00999999977 : f32
    %60 = vector.broadcast %cst_36 : f32 to vector<2x16xf32>
    %61 = arith.mulf %60, %57 : vector<2x16xf32>
    %62 = arith.select %59, %57, %61 : vector<2x16xi1>, vector<2x16xf32>
    %c0_37 = arith.constant 0 : index
    %c0_38 = arith.constant 0 : index
    %63 = vector.load %arg15[%c0_37, %c0_38] : memref<16x3xf32, #tpu.memory_space<vmem>>, vector<16x3xf32>
    %cst_39 = arith.constant dense<0.000000e+00> : vector<2x3xf32>
    %64 = tpu.matmul %62, %63, %cst_39 {dimension_numbers = #tpu.dot_dimension_numbers<[1], [0], [0], [1], [0, 0, 1, 1], [], []>} : vector<2x16xf32>, vector<16x3xf32>, vector<2x3xf32> -> vector<2x3xf32>
    %c0_40 = arith.constant 0 : index
    %c0_41 = arith.constant 0 : index
    %65 = vector.load %arg16[%c0_40, %c0_41] : memref<1x3xf32, #tpu.memory_space<vmem>>, vector<1x3xf32>
    %66 = vector.broadcast %65 : vector<1x3xf32> to vector<2x3xf32>
    %67 = arith.addf %64, %66 : vector<2x3xf32>
    %cst_42 = arith.constant dense<0xFF800000> : vector<2xf32>
    %68 = vector.multi_reduction <maximumf>, %67, %cst_42 [1] : vector<2x3xf32> to vector<2xf32>
    %69 = vector.shape_cast %68 : vector<2xf32> to vector<2x1xf32>
    %70 = vector.broadcast %69 : vector<2x1xf32> to vector<2x3xf32>
    %71 = arith.subf %67, %70 : vector<2x3xf32>
    %72 = math.exp %71 : vector<2x3xf32>
    %cst_43 = arith.constant dense<0.000000e+00> : vector<2xf32>
    %73 = vector.multi_reduction <add>, %72, %cst_43 [1] : vector<2x3xf32> to vector<2xf32>
    %74 = vector.shape_cast %73 : vector<2xf32> to vector<2x1xf32>
    %75 = tpu.reciprocal %74 {approx = true} : vector<2x1xf32> -> vector<2x1xf32>
    %76 = tpu.iota {dimensions = array<i32: 1>} : vector<2x3xi32>
    %77 = vector.broadcast %69 : vector<2x1xf32> to vector<2x3xf32>
    %78 = arith.cmpf oge, %67, %77 : vector<2x3xf32>
    %c3_i32 = arith.constant 3 : i32
    %79 = vector.broadcast %c3_i32 : i32 to vector<2x3xi32>
    %80 = arith.select %78, %76, %79 : vector<2x3xi1>, vector<2x3xi32>
    %cst_44 = arith.constant dense<2147483647> : vector<2xi32>
    %81 = vector.multi_reduction <minsi>, %80, %cst_44 [1] : vector<2x3xi32> to vector<2xi32>
    %82 = vector.shape_cast %81 : vector<2xi32> to vector<2x1xi32>
    %c0_45 = arith.constant 0 : index
    %c0_46 = arith.constant 0 : index
    %83 = vector.load %arg3[%c0_45, %c0_46] : memref<2x1xi32, #tpu.memory_space<vmem>>, vector<2x1xi32>
    %84 = tpu.iota {dimensions = array<i32: 1>} : vector<2x3xi32>
    %85 = vector.broadcast %83 : vector<2x1xi32> to vector<2x3xi32>
    %86 = arith.cmpi eq, %84, %85 : vector<2x3xi32>
    %87 = arith.extui %86 : vector<2x3xi1> to vector<2x3xi32>
    %88 = arith.sitofp %87 : vector<2x3xi32> to vector<2x3xf32>
    %89 = math.log %74 : vector<2x1xf32>
    %90 = arith.addf %69, %89 : vector<2x1xf32>
    %91 = arith.mulf %88, %67 : vector<2x3xf32>
    %cst_47 = arith.constant dense<0.000000e+00> : vector<2xf32>
    %92 = vector.multi_reduction <add>, %91, %cst_47 [1] : vector<2x3xf32> to vector<2xf32>
    %93 = vector.shape_cast %92 : vector<2xf32> to vector<2x1xf32>
    %94 = arith.subf %90, %93 : vector<2x1xf32>
    %cst_48 = arith.constant dense<0.000000e+00> : vector<1xf32>
    %95 = vector.multi_reduction <add>, %94, %cst_48 [0] : vector<2x1xf32> to vector<1xf32>
    %96 = vector.shape_cast %95 : vector<1xf32> to vector<1x1xf32>
    %cst_49 = arith.constant 2.000000e+00 : f32
    %97 = vector.broadcast %cst_49 : f32 to vector<1x1xf32>
    %98 = arith.divf %96, %97 : vector<1x1xf32>
    %cst_50 = arith.constant 0.000000e+00 : f32
    %99 = vector.broadcast %cst_50 : f32 to vector<8x128xf32>
    %c0_51 = arith.constant 0 : index
    %c0_52 = arith.constant 0 : index
    %100 = vector.load %arg17[%c0_51, %c0_52] : memref<8x128xf32, #tpu.memory_space<vmem>>, vector<8x128xf32>
    tpu.vector_store %arg17[%c0_51, %c0_52], %99 {strides = array<i32>} : memref<8x128xf32, #tpu.memory_space<vmem>>, vector<8x128xf32>,
    %c0_53 = arith.constant 0 : index
    %c0_54 = arith.constant 0 : index
    %101 = vector.load %arg17[%c0_53, %c0_54] : memref<8x128xf32, #tpu.memory_space<vmem>>, vector<2x3xf32>
    tpu.vector_store %arg17[%c0_53, %c0_54], %67 {strides = array<i32>} : memref<8x128xf32, #tpu.memory_space<vmem>>, vector<2x3xf32>,
    %c0_55 = arith.constant 0 : index
    %c3 = arith.constant 3 : index
    %102 = vector.load %arg17[%c0_55, %c3] : memref<8x128xf32, #tpu.memory_space<vmem>>, vector<2x1xf32>
    tpu.vector_store %arg17[%c0_55, %c3], %75 {strides = array<i32>} : memref<8x128xf32, #tpu.memory_space<vmem>>, vector<2x1xf32>,
    %103 = arith.sitofp %82 : vector<2x1xi32> to vector<2x1xf32>
    %c0_56 = arith.constant 0 : index
    %c4 = arith.constant 4 : index
    %104 = vector.load %arg17[%c0_56, %c4] : memref<8x128xf32, #tpu.memory_space<vmem>>, vector<2x1xf32>
    tpu.vector_store %arg17[%c0_56, %c4], %103 {strides = array<i32>} : memref<8x128xf32, #tpu.memory_space<vmem>>, vector<2x1xf32>,
    %c0_57 = arith.constant 0 : index
    %c5 = arith.constant 5 : index
    %105 = vector.load %arg17[%c0_57, %c5] : memref<8x128xf32, #tpu.memory_space<vmem>>, vector<1x1xf32>
    tpu.vector_store %arg17[%c0_57, %c5], %98 {strides = array<i32>} : memref<8x128xf32, #tpu.memory_space<vmem>>, vector<1x1xf32>,
    return
  }
}

</mosaic_0001>

<bundles_post_ra>
// kernel: model_forward.1
= control target key start
LH: loop header
LB: loop body
LE: loop exit
PB: predicated region body
PF: predicated region fallthrough
CT: control target
= control target key end

     0   :  { %v1103_v0 = vmov 0   ;;  %vm101_vm0 = vcmask 1041408   ;;  %v58_v18 = vlaneseq  ;;  %vm180_vm1 = vcmask 408576   ;;  %s1108_s18 = smov 96   ;;  %s1452_s0 = inlined_call_operand.vmem [shape: s32[16,1], index: 0, kind: input, shape index: {}]   ;;  %s1453_s1 = inlined_call_operand.vmem [shape: s32[16,1], index: 1, kind: input, shape index: {}]   ;;  %s1454_s4 = inlined_call_operand.vmem [shape: f32[50,32], index: 4, kind: input, shape index: {}]   ;;  %s1455_s2 = inlined_call_operand.vmem [shape: f32[16,1], index: 2, kind: input, shape index: {}]   ;;  %s1456_s5 = inlined_call_operand.vmem [shape: f32[2,32], index: 5, kind: input, shape index: {}]   ;;  %s1457_s7 = inlined_call_operand.vmem [shape: f32[32,32], index: 7, kind: input, shape index: {}]   ;;  %s1458_s6 = inlined_call_operand.vmem [shape: f32[8,32], index: 6, kind: input, shape index: {}]   ;;  %s1459_s9 = inlined_call_operand.vmem [shape: f32[160,48], index: 9, kind: input, shape index: {}]   ;;  %s1460_s8 = inlined_call_operand.vmem [shape: f32[1,32], index: 8, kind: input, shape index: {}]   ;;  %s1461_s3 = inlined_call_operand.vmem [shape: s32[2,1], index: 3, kind: input, shape index: {}]   ;;  %s1462_s11 = inlined_call_operand.vmem [shape: f32[48,32], index: 11, kind: input, shape index: {}]   ;;  %s1463_s10 = inlined_call_operand.vmem [shape: f32[1,48], index: 10, kind: input, shape index: {}]   ;;  %s1464_s13 = inlined_call_operand.vmem [shape: f32[32,16], index: 13, kind: input, shape index: {}]   ;;  %s1465_s12 = inlined_call_operand.vmem [shape: f32[1,32], index: 12, kind: input, shape index: {}]   ;;  %s1466_s15 = inlined_call_operand.vmem [shape: f32[16,3], index: 15, kind: input, shape index: {}]   ;;  %s1467_s14 = inlined_call_operand.vmem [shape: f32[1,16], index: 14, kind: input, shape index: {}]   ;;  %s1468_s17 = inlined_call_operand.vmem [shape: f32[8,128], index: 17, kind: output, shape index: {}]   ;;  %s1469_s16 = inlined_call_operand.vmem [shape: f32[1,3], index: 16, kind: input, shape index: {}]  }
   0x1   :  { %1472 = sst [smem:[#allocation2_spill]] %s1452_s0  ;;  %1092 = vset.pattern.permute.xlu1 %v1103_v0  ;;  %1091 = vset.pattern.permute.xlu0 %v1103_v0  ;;  %v72_v5 = vld [vmem:[%s1454_s4] sm:$0xff]  ;;  %v73_v6 = vld [vmem:[%s1454_s4 + $0x8] sm:$0xff]  ;;  %v74_v7 = vld [vmem:[%s1454_s4 + $0x10] sm:$0xff]  ;;  %v1104_v22 = vmov 0.0   ;;  %vm94_vm4 = vcmask 15360  }
   0x2   :  { %1473 = sst [smem:[#allocation3_spill]] %s1453_s1  ;;  %s1474_s26 = sld [smem:[#allocation2_spill]]  ;;  %v1014_v8 = vpack.c.bf16 %v73_v6, %v72_v5  ;;  %v75_v9 = vld [vmem:[%s1454_s4 + $0x18] sm:$0xff]  ;;  %v76_v11 = vld [vmem:[%s1454_s4 + $0x20] sm:$0xff]  ;;  %v77_v12 = vld [vmem:[%s1454_s4 + $0x28] sm:$0xff]  ;;  %v1246_v19 = vand.u32 127, %v58_v18  ;;  %879 = vst [vmem:[%s1468_s17] sm:$0xff] %v1104_v22 }
   0x3   :  { %s1475_s30 = sld [smem:[#allocation3_spill]]  ;;  %v1018_v10 = vpack.c.bf16 %v75_v9, %v74_v7  ;;  %v93_v13 = vld [vmem:[%s1456_s5] sm:$0x3]  ;;  %v364_v14 = vld [vmem:[%s1455_s2 + $0x8] sm:$0xff]  ;;  %v1022_v16 = vpack.c.bf16 %v77_v12, %v76_v11  ;;  %v78_v17 = vld [vmem:[%s1454_s4 + $0x30] sm:$0x3] }
   0x4   :  { %v363_v15 = vld [vmem:[%s1455_s2] sm:$0xff]  ;;  %1015 = vmatprep.subr.bf16.mxu0 %v1014_v8  ;;  %948 = vmatprep.subr.msk.mxu1 %vm101_vm0, %v93_v13  ;;  %v269_v30 = vld [vmem:[%s1457_s7 + $0x8] sm:$0xff]  ;;  %v270_v32 = vld [vmem:[%s1457_s7 + $0x10] sm:$0xff]  ;;  %vm279_vm7 = vcmask 261120   ;;  %v1105_v44 = vmov 0.0|0.0   ;;  %vm430_vm8 = vcmask 1043456  }
   0x5   :  { %1017 = vmatpush3.bf16.msra.mxu0 %v1014_v8  ;;  %949 = vmatpush3.msk.msra.mxu1 %vm101_vm0, %v93_v13  ;;  %v268_v29 = vld [vmem:[%s1457_s7] sm:$0xff]  ;;  %v271_v33 = vld [vmem:[%s1457_s7 + $0x18] sm:$0xff]  ;;  %v446_v46 = vld [vmem:[%s1459_s9 + $0x8] sm:$0xff]  ;;  %vm404_vm9 = vcmask 1045504   ;;  %vm391_vm10 = vcmask 1046528   ;;  %vm417_vm11 = vcmask 1044480  }
   0x6   :  { %1019 = vmatprep.subr.bf16.mxu0 %v1018_v10  ;;  %v1026_v31 = vpack.c.bf16 %v269_v30, %v268_v29  ;;  %v1030_v34 = vpack.c.bf16 %v271_v33, %v270_v32  ;;  %v265_v39 = vld [vmem:[%s1458_s6] sm:$0xff]  ;;  %1034 = vmatprep.subr.bf16.mxu1 %v1105_v44  ;;  %v447_v47 = vld [vmem:[%s1459_s9 + $0x10] sm:$0xff]  ;;  %v448_v49 = vld [vmem:[%s1459_s9 + $0x18] sm:$0xff]  ;;  %vm439_vm12 = vcmask 523264   ;;  %vm442_vm13 = vcmask 785408  }
   0x7   :  { %v445_v45 = vld [vmem:[%s1459_s9] sm:$0xff]  ;;  %v1038_v50 = vpack.c.bf16 %v448_v49, %v447_v47  ;;  %v450_v52 = vld [vmem:[%s1459_s9 + $0x28] sm:$0xff]  ;;  %v451_v54 = vld [vmem:[%s1459_s9 + $0x30] sm:$0xff]  ;;  %vm1109_vm14 = vmmov 0   ;;  %vm553_vm15 = vcmask 392192  }
   0x8   :  { %v57_v1 = vld [vmem:[%s1474_s26 + $0x8] sm:$0xff]  ;;  %v56_v2 = vld [vmem:[%s1474_s26] sm:$0xff]  ;;  %v1035_v48 = vpack.c.bf16 %v446_v46, %v445_v45  ;;  %v452_v55 = vld [vmem:[%s1459_s9 + $0x38] sm:$0xff] }
   0x9   :  { %64 = vperm.xlu1 %1092, %v57_v1   ;;  %61 = vperm.xlu0 %1091, %v56_v2   ;;  %v80_v3 = vld [vmem:[%s1475_s30 + $0x8] sm:$0xff]  ;;  %v79_v4 = vld [vmem:[%s1475_s30] sm:$0xff]  ;;  %v1044_v56 = vpack.c.bf16 %v452_v55, %v451_v54  ;;  %v455_v60 = vld [vmem:[%s1459_s9 + $0x50] sm:$0xff] }
   0xa   :  { %1021 = vmatpush3.bf16.msra.mxu0 %v1018_v10  ;;  %v449_v51 = vld [vmem:[%s1459_s9 + $0x20] sm:$0xff]  ;;  %v454_v58 = vld [vmem:[%s1459_s9 + $0x48] sm:$0xff]  ;;  %v456_v61 = vld [vmem:[%s1459_s9 + $0x58] sm:$0xff] }
   0xb   :  { %1023 = vmatprep.subr.bf16.mxu0 %v1022_v16  ;;  %v1041_v53 = vpack.c.bf16 %v450_v52, %v449_v51  ;;  %v453_v57 = vld [vmem:[%s1459_s9 + $0x40] sm:$0xff]  ;;  %v1050_v62 = vpack.c.bf16 %v456_v61, %v455_v60  ;;  %v458_v0 = vld [vmem:[%s1459_s9 + $0x68] sm:$0xff]  ;;  %v459_v2 = vld [vmem:[%s1459_s9 + $0x70] sm:$0xff] }
   0xc   :  { %v1047_v59 = vpack.c.bf16 %v454_v58, %v453_v57  ;;  %v457_v63 = vld [vmem:[%s1459_s9 + $0x60] sm:$0xff]  ;;  %v462_v6 = vld [vmem:[%s1459_s9 + $0x88] sm:$0xff]  ;;  %v463_v13 = vld [vmem:[%s1459_s9 + $0x90] sm:$0xff] }
   0xd   :  { %85 = vperm.xlu1 %1092, %v80_v3   ;;  %82 = vperm.xlu0 %1091, %v79_v4   ;;  %v1053_v1 = vpack.c.bf16 %v458_v0, %v457_v63  ;;  %v460_v3 = vld [vmem:[%s1459_s9 + $0x78] sm:$0xff]  ;;  %v461_v5 = vld [vmem:[%s1459_s9 + $0x80] sm:$0xff] }
   0xe   :  { %1025 = vmatpush3.bf16.msra.mxu0 %v1022_v16  ;;  %v1056_v4 = vpack.c.bf16 %v460_v3, %v459_v2  ;;  %v1059_v7 = vpack.c.bf16 %v462_v6, %v461_v5  ;;  %v902_v8 = vld [vmem:[%s1460_s8] ss:$0 sm:$0xff]  ;;  %s1106_s8 = smov 64   ;;  %v569_v5 = vld [vmem:[%s1462_s11 + $0x8] sm:$0xff] }
   0xf   :  { %965 = vmatprep.subr.msk.mxu0 %vm101_vm0, %v78_v17  ;;  %v855_v55 = vld [vmem:[%s1461_s3] sm:$0x3] }
  0x11   :  { %372 = vperm.xlu1 %1092, %v364_v14   ;;  %367 = vperm.xlu0 %1091, %v363_v15   ;;  %v464_v14 = vld [vmem:[%s1459_s9 + $0x98] sm:$0xff]  ;;  %s1107_s9 = smov 32  }
  0x12   :  { %966 = vmatpush3.msk.msra.mxu0 %vm101_vm0, %v78_v17  ;;  %v1062_v15 = vpack.c.bf16 %v464_v14, %v463_v13  ;;  %v905_v13 = vld [vmem:[%s1463_s10] ss:$0 sm:$0xff] }
  0x13   :  { %1027 = vmatprep.subr.bf16.mxu0 %v1026_v31 }
  0x88   :  { %v65_v20 = vpop.permute.xlu1 %64  ;;  %v62_v21 = vpop.permute.xlu0 %61 }
  0x89   :  { %vm67_vm2 = vcmp.eq.s32.totalorder %v1246_v19, %v65_v20  ;;  %vm66_vm3 = vcmp.eq.s32.totalorder %v1246_v19, %v62_v21 }
  0x8a   :  { %v893_v23 = vsel %vm67_vm2, 1.0, %v1104_v22  ;;  %v892_v24 = vsel %vm66_vm3, 1.0, %v1104_v22  ;;  %vm753_vm3 = vcmask 130048  }
  0x8b   :  { %967 = vmatprep.mubr.msk.f32.mxu0 %vm180_vm1, %v892_v24 }
  0x8c   :  { %v86_v25 = vpop.permute.xlu1 %85  ;;  %968 = vmatmul.mubr.msk.f32.vlgmr.msra.gmra.mrb[0].mxu0 %vm180_vm1, %v893_v23  ;;  %v83_v26 = vpop.permute.xlu0 %82  ;;  %vm583_vm1 = vcmask 1041409  }
  0x8d   :  { %vm88_vm5 = vcmp.eq.s32.totalorder %v1246_v19, %v86_v25  ;;  %vm87_vm6 = vcmp.eq.s32.totalorder %v1246_v19, %v83_v26  ;;  %1029 = vmatpush3.bf16.msra.mxu0 %v1026_v31 }
  0x8e   :  { %v895_v27 = vsel %vm88_vm5, 1.0, %v1104_v22  ;;  %v894_v28 = vsel %vm87_vm6, 1.0, %v1104_v22  ;;  %1031 = vmatprep.subr.bf16.mxu0 %v1030_v34 }
  0x8f   :  { %950 = vmatprep.mubr.msk.f32.mxu1 %vm94_vm4, %v894_v28 }
  0x90   :  { %951 = vmatmul.mubr.msk.f32.vlgmr.msra.gmra.mrb[0].mxu1 %vm94_vm4, %v895_v27  ;;  %v373_v17 = vpop.permute.xlu1 %372  ;;  %v368_v20 = vpop.permute.xlu0 %367  ;;  %vm827_vm4 = vcmask 17408  }
  0x91   :  { %1033 = vmatpush3.bf16.msra.mxu0 %v1030_v34  ;;  %1036 = vmatpush1.bf16.msra.mxu1 %v1035_v48 }
  0x92   :  { %1064 = vmatprep.subr.bf16.mxu0 %v1105_v44  ;;  %1037 = vmatprep.subr.bf16.mxu1 %v1105_v44 }
  0x95   :  { %1039 = vmatpush1.bf16.msra.mxu1 %v1038_v50 }
  0x96   :  { %1040 = vmatprep.subr.bf16.mxu1 %v1105_v44 }
  0x99   :  { %1042 = vmatpush1.bf16.msra.mxu1 %v1041_v53 }
  0x9a   :  { %1043 = vmatprep.subr.bf16.mxu1 %v1105_v44 }
  0x9d   :  { %1045 = vmatpush1.bf16.msra.mxu1 %v1044_v56 }
  0x9e   :  { %1046 = vmatprep.subr.bf16.mxu1 %v1105_v44 }
  0xa1   :  { %1048 = vmatpush1.bf16.msra.mxu1 %v1047_v59 }
  0xa2   :  { %1049 = vmatprep.subr.bf16.mxu1 %v1105_v44 }
  0xa5   :  { %1051 = vmatpush1.bf16.msra.mxu1 %v1050_v62 }
  0xa6   :  { %1052 = vmatprep.subr.bf16.mxu1 %v1105_v44 }
  0xa9   :  { %1054 = vmatpush1.bf16.msra.mxu1 %v1053_v1 }
  0xaa   :  { %1055 = vmatprep.subr.bf16.mxu1 %v1105_v44 }
  0xad   :  { %1057 = vmatpush1.bf16.msra.mxu1 %v1056_v4  ;;  %v568_v4 = vld [vmem:[%s1462_s11] sm:$0xff] }
  0xae   :  { %1058 = vmatprep.subr.bf16.mxu1 %v1105_v44  ;;  %v1065_v6 = vpack.c.bf16 %v569_v5, %v568_v4 }
  0xb1   :  { %1060 = vmatpush1.bf16.msra.mxu1 %v1059_v7  ;;  %v570_v7 = vld [vmem:[%s1462_s11 + $0x10] sm:$0xff] }
  0xb2   :  { %1061 = vmatprep.subr.bf16.mxu1 %v1105_v44 }
  0xb5   :  { %1063 = vmatpush1.bf16.msra.mxu1 %v1062_v15 }
 0x15f   :  { %v969_v35 = vpop.f32.mrb[0].mxu0 }
 0x160   :  { %v256_v36 = vpop.f32.mrb[1].mxu0 }
 0x163   :  { %v952_v37 = vpop.f32.mrb[0].mxu1 }
 0x164   :  { %v262_v38 = vadd.f32 %v969_v35, %v952_v37  ;;  %v171_v40 = vpop.f32.mrb[1].mxu1 }
 0x165   :  { %v257_v41 = vadd.f32 %v256_v36, %v171_v40 }
 0x166   :  { %v267_v43 = vadd.f32 %v265_v39, %v262_v38 }
 0x167   :  { %v266_v42 = vadd.f32 %v265_v39, %v257_v41 }
 0x169   :  { %978 = vmatprep.mubr.msk.f32.mxu0 %vm279_vm7, %v266_v42 }
 0x16a   :  { %979 = vmatmul.mubr.msk.f32.vlgmr.msra.gmra.mrb[2].mxu0 %vm279_vm7, %v267_v43 }
 0x16b   :  { %1066 = vmatpush3.bf16.msra.mxu0 %v1065_v6  ;;  %993 = vmatprep.mubr.msk.f32.mxu0 %vm1109_vm14, %v1104_v22 }
 0x16c   :  { %1067 = vmatprep.subr.bf16.mxu0 %v1105_v44 }
 0x23d   :  { %v980_v9 = vpop.f32.mrb[2].mxu0 }
 0x23e   :  { %v358_v10 = vadd.f32 %v980_v9, %v902_v8  ;;  %v352_v11 = vpop.f32.mrb[3].mxu0 }
 0x23f   :  { %v353_v12 = vadd.f32 %v902_v8, %v352_v11  ;;  %v571_v8 = vld [vmem:[%s1462_s11 + $0x18] sm:$0xff]  ;;  %v573_v11 = vld [vmem:[%s1462_s11 + $0x28] sm:$0xff] }
 0x240   :  { %1093 = vtanh.f32 %v358_v10  ;;  %v1068_v9 = vpack.c.bf16 %v571_v8, %v570_v7  ;;  %v572_v10 = vld [vmem:[%s1462_s11 + $0x20] sm:$0xff] }
 0x241   :  { %1095 = vtanh.f32 %v353_v12  ;;  %v1071_v12 = vpack.c.bf16 %v573_v11, %v572_v10 }
 0x242   :  { %1069 = vmatpush3.bf16.msra.mxu0 %v1068_v9 }
 0x243   :  { %1070 = vmatprep.subr.bf16.mxu0 %v1105_v44 }
 0x246   :  { %1072 = vmatpush3.bf16.msra.mxu0 %v1071_v12 }
 0x247   :  { %1073 = vmatprep.subr.bf16.mxu0 %v1105_v44 }
 0x24a   :  { %v1094_v16 = vpop.eup %1093 }
 0x24b   :  { %v1096_v18 = vpop.eup %1095  ;;  %v376_v21 = vmul.f32 %v1094_v16, %v373_v17 }
 0x24c   :  { %v375_v23 = vmul.f32 %v1096_v18, %v368_v20 }
 0x24d   :  { %v380_v24 = vrot.slane %v376_v21, 6 }
 0x24e   :  { %v379_v25 = vrot.slane %v375_v23, 6 }
 0x24f   :  { %v384_v28 = vsel %vm101_vm0, 0.0, %v380_v24  ;;  %v386_v29 = vsel %vm101_vm0, %v380_v24, 0.0 }
 0x250   :  { %v383_v26 = vsel %vm101_vm0, 0.0, %v379_v25  ;;  %v385_v27 = vsel %vm101_vm0, %v379_v25, 0.0  ;;  %v395_v38 = vrot.slane %v384_v28, 1  ;;  %v396_v39 = vrot.slane %v386_v29, 1 }
 0x251   :  { %v431_v30 = vrot.slane %v383_v26, 4  ;;  %v432_v31 = vrot.slane %v385_v27, 4  ;;  %v405_v32 = vrot.slane %v383_v26, 2  ;;  %v406_v33 = vrot.slane %v385_v27, 2 }
 0x252   :  { %v392_v34 = vrot.slane %v383_v26, 1  ;;  %v393_v35 = vrot.slane %v385_v27, 1  ;;  %v418_v41 = vrot.slane %v383_v26, 3  ;;  %v419_v42 = vrot.slane %v385_v27, 3 }
 0x253   :  { %v433_v36 = vsel %vm430_vm8, %v431_v30, %v432_v31  ;;  %v407_v37 = vsel %vm404_vm9, %v405_v32, %v406_v33  ;;  %v434_v43 = vrot.slane %v384_v28, 4  ;;  %v435_v45 = vrot.slane %v386_v29, 4 }
 0x254   :  { %906 = vmatprep.mubr.msk.f32.mxu1 %vm279_vm7, %v433_v36  ;;  %411 = vrot.lane.b32.xlu1 %v407_v37, %s1106_s8  ;;  %v394_v40 = vsel %vm391_vm10, %v392_v34, %v393_v35  ;;  %v397_v46 = vsel %vm391_vm10, %v395_v38, %v396_v39  ;;  %v421_v47 = vrot.slane %v384_v28, 3  ;;  %v422_v48 = vrot.slane %v386_v29, 3  ;;  %v657_v35 = vld [vmem:[%s1464_s13] sm:$0xff]  ;;  %v658_v36 = vld [vmem:[%s1464_s13 + $0x8] sm:$0xff] }
 0x255   :  { %398 = vrot.lane.b32.xlu0 %v394_v40, %s1107_s9  ;;  %v436_v49 = vsel %vm430_vm8, %v434_v43, %v435_v45  ;;  %v420_v50 = vsel %vm417_vm11, %v418_v41, %v419_v42  ;;  %v408_v51 = vrot.slane %v384_v28, 2  ;;  %v409_v52 = vrot.slane %v386_v29, 2  ;;  %v659_v42 = vld [vmem:[%s1464_s13 + $0x10] sm:$0xff]  ;;  %v660_v43 = vld [vmem:[%s1464_s13 + $0x18] sm:$0xff] }
 0x256   :  { %v423_v53 = vsel %vm417_vm11, %v421_v47, %v422_v48  ;;  %v1074_v40 = vpack.c.bf16 %v658_v36, %v657_v35  ;;  %v1077_v45 = vpack.c.bf16 %v660_v43, %v659_v42  ;;  %vm881_vm8 = vcmask 25624  }
 0x257   :  { %v410_v54 = vsel %vm404_vm9, %v408_v51, %v409_v52  ;;  %v910_v52 = vld [vmem:[%s1467_s14] ss:$0 sm:$0xff]  ;;  %vm884_vm9 = vcmask 33824   ;;  %vm886_vm10 = vcmask 41000  }
 0x258   :  { %400 = vrot.lane.b32.xlu1 %v397_v46, %s1107_s9  ;;  %v908_v46 = vld [vmem:[%s1465_s12] ss:$0 sm:$0xff] }
 0x259   :  { %424 = vrot.lane.b32.xlu0 %v420_v50, %s1108_s18  ;;  %v744_v50 = vld [vmem:[%s1466_s15] sm:$0xff] }
 0x25c   :  { %426 = vrot.lane.b32.xlu1 %v423_v53, %s1108_s18 }
 0x25d   :  { %413 = vrot.lane.b32.xlu0 %v410_v54, %s1106_s8 }
 0x260   :  { %857 = vperm.xlu1 %1092, %v855_v55  }
 0x2c6   :  { %v412_v56 = vpop.permute.xlu1 %411 }
 0x2c7   :  { %v399_v57 = vpop.permute.xlu0 %398 }
 0x2c8   :  { %v437_v58 = vsel %vm279_vm7, %v383_v26, %v399_v57 }
 0x2c9   :  { %v440_v60 = vsel %vm439_vm12, %v437_v58, %v412_v56  ;;  %v912_v58 = vld [vmem:[%s1469_s16] ss:$0 sm:$0xff] }
 0x2ca   :  { %v401_v59 = vpop.permute.xlu1 %400 }
 0x2cb   :  { %v425_v61 = vpop.permute.xlu0 %424  ;;  %v438_v0 = vsel %vm279_vm7, %v384_v28, %v401_v59 }
 0x2cc   :  { %v443_v62 = vsel %vm442_vm13, %v440_v60, %v425_v61 }
 0x2cd   :  { %541 = vmatmul.mubr.f32.vlgmr.msra.gmra.mrb[2].mxu1 %v443_v62 }
 0x2ce   :  { %907 = vmatprep.mubr.msk.f32.mxu1 %vm279_vm7, %v436_v49  ;;  %v427_v63 = vpop.permute.xlu1 %426 }
 0x2cf   :  { %v414_v1 = vpop.permute.xlu0 %413 }
 0x2d0   :  { %v441_v2 = vsel %vm439_vm12, %v438_v0, %v414_v1 }
 0x2d1   :  { %v444_v3 = vsel %vm442_vm13, %v441_v2, %v427_v63 }
 0x2d2   :  { %546 = vmatmul.mubr.f32.gmra.mrb[4].mxu1 %v444_v3 }
 0x2df   :  { %v858_v6 = vpop.permute.xlu1 %857 }
 0x2e0   :  { %vm859_vm6 = vcmp.eq.s32.totalorder %v1246_v19, %v858_v6 }
 0x2e1   :  { %v914_v8 = vsel %vm859_vm6, 1.0, %v1104_v22 }
 0x3a0   :  { %v542_v14 = vpop.f32.mrb[2].mxu1 }
 0x3a1   :  { %v543_v15 = vadd.f32 %v905_v13, %v542_v14  ;;  %v544_v16 = vpop.f32.mrb[3].mxu1 }
 0x3a3   :  { %v551_v17 = vmax.f32 %v543_v15, 0.0 }
 0x3a5   :  { %v554_v18 = vsel %vm553_vm15, %v551_v17, -inf  ;;  %v547_v20 = vpop.f32.mrb[4].mxu1 }
 0x3a6   :  { %v555_v21 = vrot.slane %v554_v18, 4  ;;  %v548_v23 = vadd.f32 %v905_v13, %v547_v20  ;;  %v549_v24 = vpop.f32.mrb[5].mxu1 }
 0x3a8   :  { %v556_v25 = vmax.f32 %v554_v18, %v555_v21  ;;  %v552_v26 = vmax.f32 %v548_v23, 0.0 }
 0x3aa   :  { %v557_v27 = vrot.slane %v556_v25, 2  ;;  %v561_v28 = vsel %vm553_vm15, %v552_v26, -inf }
 0x3ab   :  { %v562_v29 = vrot.slane %v561_v28, 4 }
 0x3ac   :  { %v558_v30 = vmax.f32 %v556_v25, %v557_v27 }
 0x3ad   :  { %v563_v31 = vmax.f32 %v561_v28, %v562_v29 }
 0x3ae   :  { %v559_v33 = vrot.slane %v558_v30, 1 }
 0x3af   :  { %v564_v32 = vrot.slane %v563_v31, 2 }
 0x3b0   :  { %v560_v38 = vmax.f32 %v558_v30, %v559_v33 }
 0x3b1   :  { %v565_v34 = vmax.f32 %v563_v31, %v564_v32 }
 0x3b3   :  { %v566_v37 = vrot.slane %v565_v34, 1 }
 0x3b5   :  { %v567_v39 = vmax.f32 %v565_v34, %v566_v37 }
 0x3b7   :  { %v584_v41 = vsel %vm583_vm1, %v567_v39, %v560_v38 }
 0x3b8   :  { %994 = vmatmul.mubr.msk.f32.vlgmr.msra.gmra.mrb[4].mxu0 %vm553_vm15, %v584_v41 }
 0x3b9   :  { %1075 = vmatpush3.bf16.msra.mxu0 %v1074_v40  ;;  %1004 = vmatprep.mubr.msk.f32.mxu0 %vm1109_vm14, %v1104_v22 }
 0x3ba   :  { %1076 = vmatprep.subr.bf16.mxu0 %v1105_v44 }
 0x3bd   :  { %1078 = vmatpush3.bf16.msra.mxu0 %v1077_v45 }
 0x3be   :  { %1079 = vmatprep.subr.bf16.mxu0 %v1105_v44  ;;  %v745_v44 = vld [vmem:[%s1466_s15 + $0x8] sm:$0xff] }
 0x3bf   :  { %v1080_v51 = vpack.c.bf16 %v745_v44, %v744_v50 }
 0x48b   :  { %v653_v47 = vpop.f32.mrb[4].mxu0 }
 0x48c   :  { %v654_v48 = vadd.f32 %v908_v46, %v653_v47  ;;  %v995_v49 = vpop.f32.mrb[5].mxu0 }
 0x48e   :  { %1005 = vmatmul.mubr.msk.f32.vlgmr.msra.gmra.mrb[6].mxu0 %vm279_vm7, %v654_v48 }
 0x48f   :  { %1011 = vmatprep.mubr.msk.f32.mxu0 %vm1109_vm14, %v1104_v22  ;;  %1081 = vmatpush3.bf16.msra.mxu0 %v1080_v51 }
 0x561   :  { %v737_v53 = vpop.f32.mrb[6].mxu0 }
 0x562   :  { %v738_v54 = vadd.f32 %v910_v52, %v737_v53  ;;  %v1006_v55 = vpop.f32.mrb[7].mxu0 }
 0x564   :  { %vm741_vm2 = vcmp.gt.f32.partialorder %v738_v54, 0.0  ;;  %v742_v56 = vmul.f32 0.01, %v738_v54 }
 0x566   :  { %v743_v57 = vsel %vm741_vm2, %v738_v54, %v742_v56 }
 0x567   :  { %1012 = vmatmul.mubr.msk.f32.vlgmr.msra.gmra.mrb[8].mxu0 %vm753_vm3, %v743_v57 }
 0x63a   :  { %v823_v59 = vpop.f32.mrb[8].mxu0 }
 0x63b   :  { %v824_v60 = vadd.f32 %v912_v58, %v823_v59  ;;  %v1013_v61 = vpop.f32.mrb[9].mxu0 }
 0x63d   :  { %v828_v62 = vsel %vm827_vm4, %v824_v60, -inf  ;;  %880 = vst.msk [vmem:[%s1468_s17] sm:$0x3] %vm827_vm4, %v824_v60  ;;  %v865_v10 = vmul.f32 %v914_v8, %v824_v60 }
 0x63e   :  { %829 = vmax.xlane.f32.xlu0 %v828_v62 }
 0x63f   :  { %v866_v11 = vsel %vm827_vm4, %v865_v10, 0.0 }
 0x6cb   :  { %v830_v63 = vpop.xlane.xlu0 %829 }
 0x6cc   :  { %v831_v0 = vsub.f32 %v824_v60, %v830_v63  ;;  %vm838_vm5 = vcmp.ge.f32.partialorder %v824_v60, %v830_v63 }
 0x6cd   :  { %v839_v1 = vsel %vm838_vm5, %v1246_v19, 3 }
 0x6ce   :  { %v832_v2 = vmul.f32 1.442695, %v831_v0  ;;  %v840_v3 = vsel %vm827_vm4, %v839_v1, 2147483647 }
 0x6cf   :  { %v842_v4 = vshra.s32 %v840_v3, 16  ;;  %v841_v12 = vand.u32 65535, %v840_v3 }
 0x6d0   :  { %1097 = vpow2.f32 %v832_v2 }
 0x6d1   :  { %v844_v5 = vcvt.s32.f32 %v842_v4  ;;  %v843_v14 = vcvt.s32.f32 %v841_v12 }
 0x6d3   :  { %845 = vmin.xlane.f32.xlu1 %v844_v5 }
 0x6da   :  { %v1098_v7 = vpop.eup %1097 }
 0x6db   :  { %v834_v9 = vsel %vm827_vm4, %v1098_v7, 0.0 }
 0x6dc   :  { %835 = vadd.xlane.f32.xlu0 %v834_v9 }
 0x6e0   :  { %867 = vadd.xlane.f32.xlu0 %v866_v11 }
 0x760   :  { %v846_v13 = vpop.xlane.xlu1 %845 }
 0x761   :  { %vm847_vm7 = vcmp.eq.f32.partialorder %v844_v5, %v846_v13  ;;  %v852_v28 = vcvt.f32.s32 %v846_v13 }
 0x762   :  { %v848_v15 = vsel %vm847_vm7, %v843_v14, inf }
 0x763   :  { %849 = vmin.xlane.f32.xlu0 %v848_v15  ;;  %v853_v31 = vshll.u32 %v852_v28, 16 }
 0x769   :  { %v836_v16 = vpop.xlane.xlu0 %835 }
 0x76a   :  { %1099 = vrcp.f32 %v836_v16 }
 0x76b   :  { %1101 = vlog2.f32 %v836_v16 }
 0x76d   :  { %v868_v20 = vpop.xlane.xlu0 %867 }
 0x774   :  { %v1100_v19 = vpop.eup %1099 }
 0x775   :  { %882 = vst.msk [vmem:[%s1468_s17] sm:$0x3] %vm881_vm8, %v1100_v19  ;;  %v1102_v22 = vpop.eup %1101 }
 0x776   :  { %v863_v17 = vmul.f32 0.6931472, %v1102_v22 }
 0x778   :  { %v864_v18 = vadd.f32 %v863_v17, %v830_v63 }
 0x77a   :  { %v869_v21 = vsub.f32 %v864_v18, %v868_v20 }
 0x77c   :  { %v870_v23 = vsel %vm101_vm0, %v869_v21, 0.0 }
 0x77d   :  { %v871_v24 = vrot.slane %v870_v23, 4 }
 0x77f   :  { %v872_v25 = vadd.f32 %v871_v24, %v870_v23 }
 0x781   :  { %v873_v26 = vrot.slane %v872_v25, 2 }
 0x783   :  { %v874_v27 = vadd.f32 %v873_v26, %v872_v25 }
 0x785   :  { %v875_v29 = vrot.slane %v874_v27, 1 }
 0x787   :  { %v876_v33 = vadd.f32 %v875_v29, %v874_v27 }
 0x789   :  { %v878_v36 = vmul.f32 0.5, %v876_v33 }
 0x7f0   :  { %v850_v30 = vpop.xlane.xlu0 %849 }
 0x7f1   :  { %v851_v32 = vcvt.f32.s32 %v850_v30 }
 0x7f3   :  { %v854_v34 = vadd.s32 %v853_v31, %v851_v32 }
 0x7f5   :  { %v883_v35 = vcvt.s32.f32 %v854_v34 }
 0x7f7   :  { %885 = vst.msk [vmem:[%s1468_s17] sm:$0x3] %vm884_vm9, %v883_v35 }
 0x7f8   :  { %887 = vst.msk [vmem:[%s1468_s17] sm:$0x1] %vm886_vm10, %v878_v36 }

</bundles_post_ra>
